<compile_context>
chip_gen: v7x
topology: tpu7x:2x2x1
jax: 0.10.0
libtpu: 0.0.40
codegen_flags: <defaults>
</compile_context>

<pallas_src>
import jax
import jax.numpy as jnp
from jax.experimental import pallas as pl
from jax.experimental.pallas import tpu as pltpu


LANE = 128  # TPU lane width; hidden/latent dims are padded to multiples of this.


def _round_up(n, m):
    return ((n + m - 1) // m) * m


def _pad2(a, rows, cols):
    r, c = a.shape
    return jnp.pad(a, ((0, rows - r), (0, cols - c)))


# --------------------------------------------------------------------------- #
# Kernel
# --------------------------------------------------------------------------- #
def encoder_kernel(x_ref, w1_ref, b1_ref, w2_ref, b2_ref, w3_ref, b3_ref, o_ref):
    # x arrives f32 straight from HBM; cast to bf16 here (MXU operand dtype).
    x = x_ref[...].astype(jnp.bfloat16)
    h1 = jnp.dot(x, w1_ref[...], preferred_element_type=jnp.float32) + b1_ref[...]
    h1 = jnp.maximum(h1, 0.0).astype(jnp.bfloat16)
    h2 = jnp.dot(h1, w2_ref[...], preferred_element_type=jnp.float32) + b2_ref[...]
    h2 = jnp.maximum(h2, 0.0).astype(jnp.bfloat16)
    z = jnp.dot(h2, w3_ref[...], preferred_element_type=jnp.float32) + b3_ref[...]
    o_ref[...] = z.astype(o_ref.dtype)


# --------------------------------------------------------------------------- #
# One-time parameter preparation (hoisted out of the per-call forward)
# --------------------------------------------------------------------------- #
def prepare_encoder_params(params):
    """Pad hidden/latent dims to the lane width and cast weights to bf16 ONCE.

    params = (w1, b1, w2, b2, w3, b3) with weights stored as (in, out) so the
    kernel computes y = x @ W + b (PyTorch nn.Linear stores (out, in); use the
    transposed convention when importing torch weights).

    Returns (padded_arrays, dims) where dims are static Python ints.
    """
    w1, b1, w2, b2, w3, b3 = params
    x_dim, h_dim = w1.shape
    z_dim = w3.shape[1]

    hp = _round_up(h_dim, LANE)
    zp = _round_up(z_dim, LANE)

    # NOTE: w1's K (input) dim is left at x_dim — x is passed unpadded.
    w1_p = _pad2(w1, x_dim, hp).astype(jnp.bfloat16)
    w2_p = _pad2(w2, hp, hp).astype(jnp.bfloat16)
    w3_p = _pad2(w3, hp, zp).astype(jnp.bfloat16)
    b1_p = _pad2(b1.reshape(1, -1), 1, hp).astype(jnp.float32)
    b2_p = _pad2(b2.reshape(1, -1), 1, hp).astype(jnp.float32)
    b3_p = _pad2(b3.reshape(1, -1), 1, zp).astype(jnp.float32)

    padded = (w1_p, b1_p, w2_p, b2_p, w3_p, b3_p)
    dims = (x_dim, h_dim, z_dim, hp, zp)
    return padded, dims


# --------------------------------------------------------------------------- #
# Batch-tile selection
# --------------------------------------------------------------------------- #
def _num_tensorcores():
    # v7x has 2 TensorCores per chip; v5e/v6e have 1.  Fall back to 1 on any
    # detection issue.
    try:
        kind = jax.devices()[0].device_kind.lower()
        if "v7" in kind:
            return 2
    except Exception:
        pass
    return 1


def _pick_batch_tile(B, num_cores):
    """Largest sublane-friendly tile.

    Single-TC (v5e/v6e): one big grid step (up to a cap) — per-step overhead is
    ~0.35us and there is no parallelism to gain from splitting.
    Dual-TC (v7x): exactly num_cores steps (one per core) when alignment allows.
    """
    cap = 1024  # rows; keeps x/out tiles + intermediates comfortably in VMEM.
    if num_cores >= 2 and B % num_cores == 0:
        t = B // num_cores
        if t % 8 == 0 and t <= cap:
            return t
    if B <= cap:
        return B  # grid=(1,); block == full dim is always layout-legal.
    for t in range(cap, 7, -8):  # largest sublane-aligned divisor <= cap
        if B % t == 0:
            return t
    return B


# --------------------------------------------------------------------------- #
# Forward
# --------------------------------------------------------------------------- #
def encoder_forward(x, padded_params, dims, *, batch_tile=None):
    """3-layer MLP encoder, fused into a single Pallas kernel tiled over batch."""
    w1_p, b1_p, w2_p, b2_p, w3_p, b3_p = padded_params
    x_dim, h_dim, z_dim, hp, zp = dims

    B, xd = x.shape
    assert xd == x_dim, (xd, x_dim)

    if batch_tile is None:
        batch_tile = _pick_batch_tile(B, _num_tensorcores())
    assert B % batch_tile == 0, (B, batch_tile)
    grid = (B // batch_tile,)

    def resident(shape):
        # Grid-invariant operand: constant index_map, single VMEM buffer.
        return pl.BlockSpec(shape, lambda i: (0, 0), pipeline_mode=pl.Buffered(1))

    # --- VMEM budget: resident weights/biases + double-buffered x/out tiles
    #     + f32/bf16 intermediates, with headroom; capped at 64 MiB (v7x phys).
    resident_bytes = (
        (w1_p.size + w2_p.size + w3_p.size) * 2        # bf16 weights, 1 buffer
        + (b1_p.size + b2_p.size + b3_p.size) * 4      # f32 biases
    )
    stream_bytes = 2 * batch_tile * (x_dim * 4 + zp * 4)       # 2x x-tile + 2x out-tile
    work_bytes = 2 * batch_tile * hp * (4 + 2)                  # h1/h2 in f32 + bf16
    needed = resident_bytes + stream_bytes + work_bytes
    vmem_limit = int(min(64 * 2**20, max(int(needed * 1.5) + (2 << 20), 8 << 20)))

    # --- Scheduling hint (real data movement: unpadded f32 x, bf16 weights).
    flops = 2 * B * (x_dim * hp + hp * hp + hp * zp)
    bytes_accessed = (
        B * x_dim * 4
        + (w1_p.size + w2_p.size + w3_p.size) * 2
        + (b1_p.size + b2_p.size + b3_p.size) * 4
        + B * zp * x.dtype.itemsize
    )

    out_p = pl.pallas_call(
        encoder_kernel,
        out_shape=jax.ShapeDtypeStruct((B, zp), x.dtype),
        grid_spec=pltpu.PrefetchScalarGridSpec(
            num_scalar_prefetch=0,
            grid=grid,
            in_specs=[
                # x: last dim == full array dim, so no lane padding needed.
                pl.BlockSpec((batch_tile, x_dim), lambda i: (i, 0)),
                resident((x_dim, hp)),   # w1
                resident((1, hp)),       # b1
                resident((hp, hp)),      # w2
                resident((1, hp)),       # b2
                resident((hp, zp)),      # w3
                resident((1, zp)),       # b3
            ],
            out_specs=pl.BlockSpec((batch_tile, zp), lambda i: (i, 0)),
        ),
        compiler_params=pltpu.CompilerParams(
            dimension_semantics=("parallel",),
            vmem_limit_bytes=vmem_limit,
        ),
        cost_estimate=pl.CostEstimate(
            flops=flops, transcendentals=0, bytes_accessed=bytes_accessed),
    )(x, w1_p, b1_p, w2_p, b2_p, w3_p, b3_p)

    # Drop the zero-padded latent columns (lane-dense out_spec kept; this slice
    # fuses into the consumer under jit).
    return out_p[:, :z_dim]


# --------------------------------------------------------------------------- #
# Init + pure-JAX reference
# --------------------------------------------------------------------------- #
def init_params(key, x_dim, h_dim, z_dim, dtype=jnp.float32):
    """Deterministic init mimicking PyTorch nn.Linear default (U[-1/sqrt(fan_in), +])."""
    ks = jax.random.split(key, 6)

    def linear(kw, kb, fan_in, fan_out):
        bound = 1.0 / jnp.sqrt(fan_in)
        w = jax.random.uniform(kw, (fan_in, fan_out), dtype, -bound, bound)
        b = jax.random.uniform(kb, (1, fan_out), dtype, -bound, bound)
        return w, b

    w1, b1 = linear(ks[0], ks[1], x_dim, h_dim)
    w2, b2 = linear(ks[2], ks[3], h_dim, h_dim)
    w3, b3 = linear(ks[4], ks[5], h_dim, z_dim)
    return (w1, b1, w2, b2, w3, b3)


def encoder_ref(x, params):
    w1, b1, w2, b2, w3, b3 = params
    h1 = jnp.maximum(x @ w1 + b1, 0.0)
    h2 = jnp.maximum(h1 @ w2 + b2, 0.0)
    return h2 @ w3 + b3


if __name__ == "__main__":
    key = jax.random.PRNGKey(0)
    k_x, k_p = jax.random.split(key)

    # Small shapes consistent with the module: flat features -> hidden -> latent.
    B, x_dim, h_dim, z_dim = 128, 64, 32, 16

    x = jax.random.normal(k_x, (B, x_dim), jnp.float32)
    params = init_params(k_p, x_dim, h_dim, z_dim)

    # One-time setup: pad/cast weights to lane-aligned bf16 (not per call).
    padded_params, dims = prepare_encoder_params(params)
    padded_params = jax.block_until_ready(padded_params)

    out = encoder_forward(x, padded_params, dims)
    out = jax.block_until_ready(out)

    ref = encoder_ref(x, params)  # f32 reference
    assert out.shape == (B, z_dim), out.shape
    # bf16 MXU operands with f32 accumulation -> compare at bf16-level tolerance.
    assert jnp.allclose(out, ref, atol=2e-2, rtol=2e-2), "mismatch vs. pure-JAX reference"

    print("KERNEL_OK")
</pallas_src>

<mosaic_0001>
module attributes {stable_mosaic.version = 11 : i64} {
  func.func @encoder_kernel(%arg0: i32, %arg1: memref<128x64xf32, #tpu.memory_space<vmem>>, %arg2: memref<64x128xbf16, #tpu.memory_space<vmem>>, %arg3: memref<1x128xf32, #tpu.memory_space<vmem>>, %arg4: memref<128x128xbf16, #tpu.memory_space<vmem>>, %arg5: memref<1x128xf32, #tpu.memory_space<vmem>>, %arg6: memref<128x128xbf16, #tpu.memory_space<vmem>>, %arg7: memref<1x128xf32, #tpu.memory_space<vmem>>, %arg8: memref<128x128xf32, #tpu.memory_space<vmem>>) attributes {dimension_semantics = [#tpu.dimension_semantics<parallel>], iteration_bounds = array<i64: 1>, scalar_prefetch = 0 : i64, scratch_operands = 0 : i64, tpu.core_type = #tpu.core_type<tc>, window_params = [{transform_indices = @transform_0, window_bounds = array<i64: 128, 64>}, {pipeline_mode = #tpu.pipeline_mode<synchronous>, transform_indices = @transform_1, window_bounds = array<i64: 64, 128>}, {pipeline_mode = #tpu.pipeline_mode<synchronous>, transform_indices = @transform_2, window_bounds = array<i64: 1, 128>}, {pipeline_mode = #tpu.pipeline_mode<synchronous>, transform_indices = @transform_3, window_bounds = array<i64: 128, 128>}, {pipeline_mode = #tpu.pipeline_mode<synchronous>, transform_indices = @transform_4, window_bounds = array<i64: 1, 128>}, {pipeline_mode = #tpu.pipeline_mode<synchronous>, transform_indices = @transform_5, window_bounds = array<i64: 128, 128>}, {pipeline_mode = #tpu.pipeline_mode<synchronous>, transform_indices = @transform_6, window_bounds = array<i64: 1, 128>}, {transform_indices = @transform_7, window_bounds = array<i64: 128, 128>}]} {
    %c0 = arith.constant 0 : index
    %c0_0 = arith.constant 0 : index
    %0 = vector.load %arg1[%c0, %c0_0] : memref<128x64xf32, #tpu.memory_space<vmem>>, vector<128x64xf32>
    %1 = arith.truncf %0 : vector<128x64xf32> to vector<128x64xbf16>
    %c0_1 = arith.constant 0 : index
    %c0_2 = arith.constant 0 : index
    %2 = vector.load %arg2[%c0_1, %c0_2] : memref<64x128xbf16, #tpu.memory_space<vmem>>, vector<64x128xbf16>
    %cst = arith.constant dense<0.000000e+00> : vector<128x128xf32>
    %3 = tpu.matmul %1, %2, %cst {dimension_numbers = #tpu.dot_dimension_numbers<[1], [0], [0], [1], [0, 0, 1, 1], [], []>} : vector<128x64xbf16>, vector<64x128xbf16>, vector<128x128xf32> -> vector<128x128xf32>
    %c0_3 = arith.constant 0 : index
    %c0_4 = arith.constant 0 : index
    %4 = vector.load %arg3[%c0_3, %c0_4] : memref<1x128xf32, #tpu.memory_space<vmem>>, vector<1x128xf32>
    %5 = vector.broadcast %4 : vector<1x128xf32> to vector<128x128xf32>
    %6 = arith.addf %3, %5 : vector<128x128xf32>
    %cst_5 = arith.constant 0.000000e+00 : f32
    %7 = vector.broadcast %cst_5 : f32 to vector<128x128xf32>
    %8 = arith.maximumf %6, %7 : vector<128x128xf32>
    %9 = arith.truncf %8 : vector<128x128xf32> to vector<128x128xbf16>
    %c0_6 = arith.constant 0 : index
    %c0_7 = arith.constant 0 : index
    %10 = vector.load %arg4[%c0_6, %c0_7] : memref<128x128xbf16, #tpu.memory_space<vmem>>, vector<128x128xbf16>
    %cst_8 = arith.constant dense<0.000000e+00> : vector<128x128xf32>
    %11 = tpu.matmul %9, %10, %cst_8 {dimension_numbers = #tpu.dot_dimension_numbers<[1], [0], [0], [1], [0, 0, 1, 1], [], []>} : vector<128x128xbf16>, vector<128x128xbf16>, vector<128x128xf32> -> vector<128x128xf32>
    %c0_9 = arith.constant 0 : index
    %c0_10 = arith.constant 0 : index
    %12 = vector.load %arg5[%c0_9, %c0_10] : memref<1x128xf32, #tpu.memory_space<vmem>>, vector<1x128xf32>
    %13 = vector.broadcast %12 : vector<1x128xf32> to vector<128x128xf32>
    %14 = arith.addf %11, %13 : vector<128x128xf32>
    %cst_11 = arith.constant 0.000000e+00 : f32
    %15 = vector.broadcast %cst_11 : f32 to vector<128x128xf32>
    %16 = arith.maximumf %14, %15 : vector<128x128xf32>
    %17 = arith.truncf %16 : vector<128x128xf32> to vector<128x128xbf16>
    %c0_12 = arith.constant 0 : index
    %c0_13 = arith.constant 0 : index
    %18 = vector.load %arg6[%c0_12, %c0_13] : memref<128x128xbf16, #tpu.memory_space<vmem>>, vector<128x128xbf16>
    %cst_14 = arith.constant dense<0.000000e+00> : vector<128x128xf32>
    %19 = tpu.matmul %17, %18, %cst_14 {dimension_numbers = #tpu.dot_dimension_numbers<[1], [0], [0], [1], [0, 0, 1, 1], [], []>} : vector<128x128xbf16>, vector<128x128xbf16>, vector<128x128xf32> -> vector<128x128xf32>
    %c0_15 = arith.constant 0 : index
    %c0_16 = arith.constant 0 : index
    %20 = vector.load %arg7[%c0_15, %c0_16] : memref<1x128xf32, #tpu.memory_space<vmem>>, vector<1x128xf32>
    %21 = vector.broadcast %20 : vector<1x128xf32> to vector<128x128xf32>
    %22 = arith.addf %19, %21 : vector<128x128xf32>
    %c0_17 = arith.constant 0 : index
    %c0_18 = arith.constant 0 : index
    %23 = vector.load %arg8[%c0_17, %c0_18] : memref<128x128xf32, #tpu.memory_space<vmem>>, vector<128x128xf32>
    tpu.vector_store %arg8[%c0_17, %c0_18], %22 {strides = array<i32>} : memref<128x128xf32, #tpu.memory_space<vmem>>, vector<128x128xf32>,
    return
  }
  func.func @transform_0(%arg0: i32) -> (i32, i32) {
    %c0_i32 = arith.constant 0 : i32
    %c0_i32_0 = arith.constant 0 : i32
    return %arg0, %c0_i32 : i32, i32
  }
  func.func @transform_1(%arg0: i32) -> (i32, i32) {
    %c0_i32 = arith.constant 0 : i32
    %c0_i32_0 = arith.constant 0 : i32
    %c0_i32_1 = arith.constant 0 : i32
    return %c0_i32, %c0_i32_0 : i32, i32
  }
  func.func @transform_2(%arg0: i32) -> (i32, i32) {
    %c0_i32 = arith.constant 0 : i32
    %c0_i32_0 = arith.constant 0 : i32
    %c0_i32_1 = arith.constant 0 : i32
    return %c0_i32, %c0_i32_0 : i32, i32
  }
  func.func @transform_3(%arg0: i32) -> (i32, i32) {
    %c0_i32 = arith.constant 0 : i32
    %c0_i32_0 = arith.constant 0 : i32
    %c0_i32_1 = arith.constant 0 : i32
    return %c0_i32, %c0_i32_0 : i32, i32
  }
  func.func @transform_4(%arg0: i32) -> (i32, i32) {
    %c0_i32 = arith.constant 0 : i32
    %c0_i32_0 = arith.constant 0 : i32
    %c0_i32_1 = arith.constant 0 : i32
    return %c0_i32, %c0_i32_0 : i32, i32
  }
  func.func @transform_5(%arg0: i32) -> (i32, i32) {
    %c0_i32 = arith.constant 0 : i32
    %c0_i32_0 = arith.constant 0 : i32
    %c0_i32_1 = arith.constant 0 : i32
    return %c0_i32, %c0_i32_0 : i32, i32
  }
  func.func @transform_6(%arg0: i32) -> (i32, i32) {
    %c0_i32 = arith.constant 0 : i32
    %c0_i32_0 = arith.constant 0 : i32
    %c0_i32_1 = arith.constant 0 : i32
    return %c0_i32, %c0_i32_0 : i32, i32
  }
  func.func @transform_7(%arg0: i32) -> (i32, i32) {
    %c0_i32 = arith.constant 0 : i32
    %c0_i32_0 = arith.constant 0 : i32
    return %arg0, %c0_i32 : i32, i32
  }
}

</mosaic_0001>

<bundles_post_ra>
// kernel: tpu_custom_call.1
= control target key start
LH: loop header
LB: loop body
LE: loop exit
PB: predicated region body
PF: predicated region fallthrough
CT: control target
= control target key end

     0   :  { %vm91_vm0 = vcmask 523264   ;;  %s1071_s0 = inlined_call_operand.vmem [shape: f32[128,64], index: 0, kind: input, shape index: {}]   ;;  %s1072_s1 = inlined_call_operand.vmem [shape: bf16[64,128], index: 1, kind: input, shape index: {}]   ;;  %s1073_s2 = inlined_call_operand.vmem [shape: f32[1,128], index: 2, kind: input, shape index: {}]   ;;  %s1074_s3 = inlined_call_operand.vmem [shape: bf16[128,128], index: 3, kind: input, shape index: {}]   ;;  %s1075_s4 = inlined_call_operand.vmem [shape: f32[1,128], index: 4, kind: input, shape index: {}]   ;;  %s1076_s5 = inlined_call_operand.vmem [shape: bf16[128,128], index: 5, kind: input, shape index: {}]   ;;  %s1077_s6 = inlined_call_operand.vmem [shape: f32[1,128], index: 6, kind: input, shape index: {}]   ;;  %s1078_s7 = inlined_call_operand.hbm [shape: f32[128,128], index: 7, kind: output, shape index: {}]  }
   0x1   :  { %v811_v0 = vld [vmem:[%s1072_s1] sm:$0xff]   ;;  %v812_v1 = vld [vmem:[%s1072_s1 + $0x8] sm:$0xff]   ;;  %v813_v2 = vld [vmem:[%s1072_s1 + $0x10] sm:$0xff]  }
   0x2   :  { %704 = vmatprep.subr.bf16.mxu0 %v811_v0  ;;  %v28_v3 = vld [vmem:[%s1071_s0] sm:$0xff]  ;;  %v29_v4 = vld [vmem:[%s1071_s0 + $0x8] sm:$0xff]  ;;  %v814_v6 = vld [vmem:[%s1072_s1 + $0x18] sm:$0xff]  }
   0x3   :  { %705 = vmatpush3.bf16.msra.mxu0 %v811_v0  ;;  %v44_v5 = vpack.c.bf16 %v29_v4, %v28_v3  ;;  %v30_v7 = vld [vmem:[%s1071_s0 + $0x10] sm:$0xff]  ;;  %v31_v8 = vld [vmem:[%s1071_s0 + $0x18] sm:$0xff]  ;;  %v32_v9 = vld [vmem:[%s1071_s0 + $0x20] sm:$0xff] }
   0x4   :  { %706 = vmatprep.subr.bf16.mxu0 %v812_v1  ;;  %v815_v10 = vld [vmem:[%s1074_s3] sm:$0xff]   ;;  %v816_v11 = vld [vmem:[%s1074_s3 + $0x8] sm:$0xff]   ;;  %v45_v13 = vpack.c.bf16 %v31_v8, %v30_v7  ;;  %v817_v14 = vld [vmem:[%s1074_s3 + $0x10] sm:$0xff]  }
   0x5   :  { %712 = vmatprep.mubr.msk.bf16.mxu0 %vm91_vm0, %v44_v5  ;;  %v33_v12 = vld [vmem:[%s1071_s0 + $0x28] sm:$0xff]  ;;  %728 = vmatprep.subr.bf16.mxu1 %v815_v10  ;;  %v818_v16 = vld [vmem:[%s1074_s3 + $0x18] sm:$0xff]   ;;  %v34_v17 = vld [vmem:[%s1071_s0 + $0x30] sm:$0xff] }
   0x6   :  { %729 = vmatpush3.bf16.msra.mxu1 %v815_v10  ;;  %v46_v15 = vpack.c.bf16 %v33_v12, %v32_v9  ;;  %v35_v18 = vld [vmem:[%s1071_s0 + $0x38] sm:$0xff]  ;;  %v36_v19 = vld [vmem:[%s1071_s0 + $0x40] sm:$0xff]  ;;  %v37_v20 = vld [vmem:[%s1071_s0 + $0x48] sm:$0xff] }
   0x7   :  { %707 = vmatpush3.bf16.msra.mxu0 %v812_v1  ;;  %730 = vmatprep.subr.bf16.mxu1 %v816_v11  ;;  %v47_v21 = vpack.c.bf16 %v35_v18, %v34_v17  ;;  %v819_v22 = vld [vmem:[%s1074_s3 + $0x20] sm:$0xff]  }
   0x8   :  { %708 = vmatprep.subr.bf16.mxu0 %v813_v2 }
   0xa   :  { %731 = vmatpush3.bf16.msra.mxu1 %v816_v11 }
   0xb   :  { %709 = vmatpush3.bf16.msra.mxu0 %v813_v2  ;;  %732 = vmatprep.subr.bf16.mxu1 %v817_v14 }
   0xc   :  { %710 = vmatprep.subr.bf16.mxu0 %v814_v6 }
   0xe   :  { %733 = vmatpush3.bf16.msra.mxu1 %v817_v14 }
   0xf   :  { %711 = vmatpush3.bf16.msra.mxu0 %v814_v6  ;;  %734 = vmatprep.subr.bf16.mxu1 %v818_v16 }
  0x12   :  { %713 = vmatmul.mubr.msk.bf16.vlgmr.msra.gmra.mrb[0].mxu0 %vm91_vm0, %v45_v13 }
  0x13   :  { %716 = vmatprep.mubr.msk.bf16.mxu0 %vm91_vm0, %v46_v15 }
  0x14   :  { %12 = vsyncpa [#allocation3], 0  ;;  %v48_v23 = vpack.c.bf16 %v37_v20, %v36_v19  ;;  %735 = vmatpush3.bf16.msra.mxu1 %v818_v16  ;;  %v820_v24 = vld [vmem:[%s1074_s3 + $0x28] sm:$0xff]   ;;  %v38_v25 = vld [vmem:[%s1071_s0 + $0x50] sm:$0xff] }
  0x15   :  { %736 = vmatprep.subr.bf16.mxu1 %v819_v22  ;;  %v39_v26 = vld [vmem:[%s1071_s0 + $0x58] sm:$0xff]  ;;  %v40_v27 = vld [vmem:[%s1071_s0 + $0x60] sm:$0xff]  ;;  %v41_v28 = vld [vmem:[%s1071_s0 + $0x68] sm:$0xff] }
  0x16   :  { %v49_v29 = vpack.c.bf16 %v39_v26, %v38_v25  ;;  %v50_v30 = vpack.c.bf16 %v41_v28, %v40_v27  ;;  %v42_v31 = vld [vmem:[%s1071_s0 + $0x70] sm:$0xff]  ;;  %v43_v32 = vld [vmem:[%s1071_s0 + $0x78] sm:$0xff]  ;;  %v823_v36 = vld [vmem:[%s1076_s5] sm:$0xff]  }
  0x17   :  { %v51_v33 = vpack.c.bf16 %v43_v32, %v42_v31  ;;  %v821_v34 = vld [vmem:[%s1074_s3 + $0x30] sm:$0xff]   ;;  %v822_v35 = vld [vmem:[%s1074_s3 + $0x38] sm:$0xff]   ;;  %v824_v37 = vld [vmem:[%s1076_s5 + $0x8] sm:$0xff]   ;;  %760 = vmatprep.subr.bf16.mxu0 %v823_v36 }
  0x18   :  { %737 = vmatpush3.bf16.msra.mxu1 %v819_v22  ;;  %761 = vmatpush3.bf16.msra.mxu0 %v823_v36  ;;  %v825_v38 = vld [vmem:[%s1076_s5 + $0x10] sm:$0xff]   ;;  %v1002_v39 = vld [vmem:[%s1076_s5 + $0x18] sm:$0xff]   ;;  %v1008_v40 = vld [vmem:[%s1076_s5 + $0x20] sm:$0xff]  }
  0x19   :  { %738 = vmatprep.subr.bf16.mxu1 %v820_v24  ;;  %762 = vmatprep.subr.bf16.mxu0 %v824_v37  ;;  %v1015_v41 = vld [vmem:[%s1076_s5 + $0x28] sm:$0xff]   ;;  %v1023_v42 = vld [vmem:[%s1073_s2] ss:$0 sm:$0xff] }
  0x1a   :  { %717 = vmatmul.mubr.msk.bf16.gmra.mrb[4].mxu0 %vm91_vm0, %v47_v21 }
  0x1b   :  { %720 = vmatprep.mubr.msk.bf16.mxu0 %vm91_vm0, %v48_v23 }
  0x1c   :  { %739 = vmatpush3.bf16.msra.mxu1 %v820_v24  ;;  %763 = vmatpush3.bf16.msra.mxu0 %v824_v37 }
  0x1d   :  { %740 = vmatprep.subr.bf16.mxu1 %v821_v34  ;;  %764 = vmatprep.subr.bf16.mxu0 %v825_v38 }
  0x20   :  { %741 = vmatpush3.bf16.msra.mxu1 %v821_v34  ;;  %765 = vmatpush3.bf16.msra.mxu0 %v825_v38 }
  0x21   :  { %742 = vmatprep.subr.bf16.mxu1 %v822_v35  ;;  %766 = vmatprep.subr.bf16.mxu0 %v1002_v39 }
  0x22   :  { %721 = vmatmul.mubr.msk.bf16.gmra.mrb[8].mxu0 %vm91_vm0, %v49_v29 }
  0x23   :  { %724 = vmatprep.mubr.msk.bf16.mxu0 %vm91_vm0, %v50_v30 }
  0x24   :  { %743 = vmatpush3.bf16.msra.mxu1 %v822_v35  ;;  %767 = vmatpush3.bf16.msra.mxu0 %v1002_v39  ;;  %v829_v35 = vld [vmem:[%s1076_s5 + $0x30] sm:$0xff]  }
  0x25   :  { %792 = vmatprep.subr.bf16.mxu1 %v823_v36  ;;  %768 = vmatprep.subr.bf16.mxu0 %v1008_v40 }
  0x28   :  { %769 = vmatpush3.bf16.msra.mxu0 %v1008_v40 }
  0x29   :  { %770 = vmatprep.subr.bf16.mxu0 %v1015_v41 }
  0x2a   :  { %725 = vmatmul.mubr.msk.bf16.gmra.mrb[12].mxu0 %vm91_vm0, %v51_v33 }
  0x2c   :  { %771 = vmatpush3.bf16.msra.mxu0 %v1015_v41 }
  0x2d   :  { %772 = vmatprep.subr.bf16.mxu0 %v829_v35 }
  0x30   :  { %773 = vmatpush3.bf16.msra.mxu0 %v829_v35 }
  0xe5   :  { %v714_v43 = vpop.f32.mrb[0].mxu0 }
  0xe6   :  { %v159_v44 = vadd.f32 %v714_v43, %v1023_v42  ;;  %v150_v45 = vpop.f32.mrb[1].mxu0 }
  0xe7   :  { %v151_v46 = vadd.f32 %v1023_v42, %v150_v45  ;;  %v715_v47 = vpop.f32.mrb[2].mxu0 }
  0xe8   :  { %v162_v48 = vadd.f32 %v715_v47, %v1023_v42  ;;  %v153_v49 = vpop.f32.mrb[3].mxu0  ;;  %v215_v51 = vmax.f32 %v159_v44, 0.0 }
  0xe9   :  { %v154_v50 = vadd.f32 %v1023_v42, %v153_v49  ;;  %v213_v53 = vmax.f32 %v151_v46, 0.0 }
  0xea   :  { %v216_v52 = vmax.f32 %v162_v48, 0.0 }
  0xeb   :  { %v214_v54 = vmax.f32 %v154_v50, 0.0 }
  0xec   :  { %v230_v55 = vpack.c.bf16 %v216_v52, %v215_v51 }
  0xed   :  { %v718_v56 = vpop.f32.mrb[4].mxu0  ;;  %v229_v57 = vpack.c.bf16 %v214_v54, %v213_v53 }
  0xee   :  { %v175_v58 = vadd.f32 %v718_v56, %v1023_v42  ;;  %v166_v59 = vpop.f32.mrb[5].mxu0 }
  0xef   :  { %v167_v60 = vadd.f32 %v1023_v42, %v166_v59  ;;  %v719_v61 = vpop.f32.mrb[6].mxu0  ;;  %744 = vmatprep.mubr.bf16.mxu1 %v229_v57 }
  0xf0   :  { %v178_v62 = vadd.f32 %v719_v61, %v1023_v42  ;;  %v169_v63 = vpop.f32.mrb[7].mxu0  ;;  %745 = vmatmul.mubr.bf16.vlgmr.msra.gmra.mrb[0].mxu1 %v230_v55  ;;  %v219_v1 = vmax.f32 %v175_v58, 0.0 }
  0xf1   :  { %v170_v0 = vadd.f32 %v1023_v42, %v169_v63  ;;  %800 = vmatpush3.bf16.msra.mxu1 %v823_v36  ;;  %v217_v3 = vmax.f32 %v167_v60, 0.0  ;;  %v830_v36 = vld [vmem:[%s1076_s5 + $0x38] sm:$0xff]  }
  0xf2   :  { %v220_v2 = vmax.f32 %v178_v62, 0.0  ;;  %793 = vmatprep.subr.bf16.mxu1 %v824_v37  ;;  %774 = vmatprep.subr.bf16.mxu0 %v830_v36 }
  0xf3   :  { %v218_v4 = vmax.f32 %v170_v0, 0.0  ;;  %775 = vmatpush3.bf16.msra.mxu0 %v830_v36 }
  0xf4   :  { %v232_v5 = vpack.c.bf16 %v220_v2, %v219_v1 }
  0xf5   :  { %v231_v6 = vpack.c.bf16 %v218_v4, %v217_v3  ;;  %v722_v7 = vpop.f32.mrb[8].mxu0  ;;  %801 = vmatpush3.bf16.msra.mxu1 %v824_v37  ;;  %v642_v37 = vld [vmem:[%s1075_s4] ss:$0 sm:$0xff] }
  0xf6   :  { %v191_v8 = vadd.f32 %v722_v7, %v1023_v42  ;;  %v182_v9 = vpop.f32.mrb[9].mxu0  ;;  %794 = vmatprep.subr.bf16.mxu1 %v825_v38 }
  0xf7   :  { %v183_v10 = vadd.f32 %v1023_v42, %v182_v9  ;;  %v723_v11 = vpop.f32.mrb[10].mxu0  ;;  %748 = vmatprep.mubr.bf16.mxu1 %v231_v6 }
  0xf8   :  { %v194_v12 = vadd.f32 %v723_v11, %v1023_v42  ;;  %v185_v13 = vpop.f32.mrb[11].mxu0  ;;  %749 = vmatmul.mubr.bf16.gmra.mrb[4].mxu1 %v232_v5  ;;  %v223_v15 = vmax.f32 %v191_v8, 0.0 }
  0xf9   :  { %v186_v14 = vadd.f32 %v1023_v42, %v185_v13  ;;  %802 = vmatpush3.bf16.msra.mxu1 %v825_v38  ;;  %v221_v17 = vmax.f32 %v183_v10, 0.0 }
  0xfa   :  { %v224_v16 = vmax.f32 %v194_v12, 0.0  ;;  %795 = vmatprep.subr.bf16.mxu1 %v1002_v39 }
  0xfb   :  { %v222_v18 = vmax.f32 %v186_v14, 0.0 }
  0xfc   :  { %v234_v19 = vpack.c.bf16 %v224_v16, %v223_v15 }
  0xfd   :  { %v233_v20 = vpack.c.bf16 %v222_v18, %v221_v17  ;;  %v726_v21 = vpop.f32.mrb[12].mxu0  ;;  %803 = vmatpush3.bf16.msra.mxu1 %v1002_v39 }
  0xfe   :  { %v207_v22 = vadd.f32 %v726_v21, %v1023_v42  ;;  %v198_v23 = vpop.f32.mrb[13].mxu0  ;;  %796 = vmatprep.subr.bf16.mxu1 %v1008_v40 }
  0xff   :  { %v199_v24 = vadd.f32 %v1023_v42, %v198_v23  ;;  %v727_v25 = vpop.f32.mrb[14].mxu0  ;;  %752 = vmatprep.mubr.bf16.mxu1 %v233_v20 }
 0x100   :  { %v210_v26 = vadd.f32 %v727_v25, %v1023_v42  ;;  %v201_v27 = vpop.f32.mrb[15].mxu0  ;;  %753 = vmatmul.mubr.bf16.gmra.mrb[8].mxu1 %v234_v19  ;;  %v227_v29 = vmax.f32 %v207_v22, 0.0 }
 0x101   :  { %v202_v28 = vadd.f32 %v1023_v42, %v201_v27  ;;  %804 = vmatpush3.bf16.msra.mxu1 %v1008_v40  ;;  %v225_v31 = vmax.f32 %v199_v24, 0.0 }
 0x102   :  { %v228_v30 = vmax.f32 %v210_v26, 0.0  ;;  %797 = vmatprep.subr.bf16.mxu1 %v1015_v41 }
 0x103   :  { %v226_v32 = vmax.f32 %v202_v28, 0.0 }
 0x104   :  { %v236_v33 = vpack.c.bf16 %v228_v30, %v227_v29  ;;  %v651_v30 = vld [vmem:[%s1077_s6] ss:$0 sm:$0xff]  ;;  %s855_s6 = smov [#allocation2]  }
 0x105   :  { %v235_v34 = vpack.c.bf16 %v226_v32, %v225_v31  ;;  %805 = vmatpush3.bf16.msra.mxu1 %v1015_v41  ;;  %s618_s25 = sshll.u32 %s855_s6, 4  ;;  %s619_s25 = int_to_ptr.vmem [resolvable:$true] %s618_s25 }
 0x106   :  { %798 = vmatprep.subr.bf16.mxu1 %v829_v35  ;;  %s831_s26 = scalar_lea.vmem %s619_s25, 2048  ;;  %p836_p1 = scmp.lt.s32.totalorder %s619_s25, %s619_s25 }
 0x107   :  { %756 = vmatprep.mubr.bf16.mxu1 %v235_v34  ;;  %p832_p0 = scmp.ne.s32.totalorder %s619_s25, %s831_s26  ;;  %p837_p2 = scmp.lt.s32.totalorder %s831_s26, %s831_s26 }
 0x108   :  { %757 = vmatmul.mubr.bf16.gmra.mrb[12].mxu1 %v236_v33 }
 0x109   :  { %806 = vmatpush3.bf16.msra.mxu1 %v829_v35  ;;  %p838_p3 = por %p837_p2, %p836_p1 }
 0x10a   :  { %799 = vmatprep.subr.bf16.mxu1 %v830_v36 }
 0x10b   :  { %p839_p4 = pnand %p838_p3, %p832_p0 }
 0x10d   :  { %807 = vmatpush3.bf16.msra.mxu1 %v830_v36 }
 0x1c3   :  { %v746_v38 = vpop.f32.mrb[0].mxu1 }
 0x1c4   :  { %v351_v39 = vadd.f32 %v746_v38, %v642_v37  ;;  %v342_v40 = vpop.f32.mrb[1].mxu1 }
 0x1c5   :  { %v343_v41 = vadd.f32 %v642_v37, %v342_v40  ;;  %v747_v42 = vpop.f32.mrb[2].mxu1 }
 0x1c6   :  { %v354_v43 = vadd.f32 %v747_v42, %v642_v37  ;;  %v345_v44 = vpop.f32.mrb[3].mxu1  ;;  %v407_v46 = vmax.f32 %v351_v39, 0.0 }
 0x1c7   :  { %v346_v45 = vadd.f32 %v642_v37, %v345_v44  ;;  %v405_v48 = vmax.f32 %v343_v41, 0.0 }
 0x1c8   :  { %v408_v47 = vmax.f32 %v354_v43, 0.0 }
 0x1c9   :  { %v406_v49 = vmax.f32 %v346_v45, 0.0 }
 0x1ca   :  { %v422_v50 = vpack.c.bf16 %v408_v47, %v407_v46 }
 0x1cb   :  { %v421_v51 = vpack.c.bf16 %v406_v49, %v405_v48  ;;  %v750_v52 = vpop.f32.mrb[4].mxu1 }
 0x1cc   :  { %v367_v53 = vadd.f32 %v750_v52, %v642_v37  ;;  %v358_v54 = vpop.f32.mrb[5].mxu1 }
 0x1cd   :  { %v359_v55 = vadd.f32 %v642_v37, %v358_v54  ;;  %v751_v56 = vpop.f32.mrb[6].mxu1  ;;  %776 = vmatprep.mubr.bf16.mxu0 %v421_v51 }
 0x1ce   :  { %v370_v57 = vadd.f32 %v751_v56, %v642_v37  ;;  %v361_v58 = vpop.f32.mrb[7].mxu1  ;;  %777 = vmatmul.mubr.bf16.vlgmr.msra.gmra.mrb[16].mxu0 %v422_v50  ;;  %v411_v60 = vmax.f32 %v367_v53, 0.0 }
 0x1cf   :  { %v362_v59 = vadd.f32 %v642_v37, %v361_v58  ;;  %v409_v62 = vmax.f32 %v359_v55, 0.0 }
 0x1d0   :  { %v412_v61 = vmax.f32 %v370_v57, 0.0 }
 0x1d1   :  { %v410_v63 = vmax.f32 %v362_v59, 0.0 }
 0x1d2   :  { %v424_v0 = vpack.c.bf16 %v412_v61, %v411_v60 }
 0x1d3   :  { %v423_v1 = vpack.c.bf16 %v410_v63, %v409_v62  ;;  %v754_v2 = vpop.f32.mrb[8].mxu1 }
 0x1d4   :  { %v383_v3 = vadd.f32 %v754_v2, %v642_v37  ;;  %v374_v4 = vpop.f32.mrb[9].mxu1 }
 0x1d5   :  { %v375_v5 = vadd.f32 %v642_v37, %v374_v4  ;;  %v755_v6 = vpop.f32.mrb[10].mxu1  ;;  %780 = vmatprep.mubr.bf16.mxu0 %v423_v1 }
 0x1d6   :  { %v386_v7 = vadd.f32 %v755_v6, %v642_v37  ;;  %v377_v8 = vpop.f32.mrb[11].mxu1  ;;  %781 = vmatmul.mubr.bf16.gmra.mrb[20].mxu0 %v424_v0  ;;  %v415_v10 = vmax.f32 %v383_v3, 0.0 }
 0x1d7   :  { %v378_v9 = vadd.f32 %v642_v37, %v377_v8  ;;  %v413_v12 = vmax.f32 %v375_v5, 0.0 }
 0x1d8   :  { %v416_v11 = vmax.f32 %v386_v7, 0.0 }
 0x1d9   :  { %v414_v13 = vmax.f32 %v378_v9, 0.0 }
 0x1da   :  { %v426_v14 = vpack.c.bf16 %v416_v11, %v415_v10 }
 0x1db   :  { %v425_v15 = vpack.c.bf16 %v414_v13, %v413_v12  ;;  %v758_v16 = vpop.f32.mrb[12].mxu1 }
 0x1dc   :  { %v399_v17 = vadd.f32 %v758_v16, %v642_v37  ;;  %v390_v18 = vpop.f32.mrb[13].mxu1 }
 0x1dd   :  { %v391_v19 = vadd.f32 %v642_v37, %v390_v18  ;;  %v759_v20 = vpop.f32.mrb[14].mxu1  ;;  %784 = vmatprep.mubr.bf16.mxu0 %v425_v15 }
 0x1de   :  { %v402_v21 = vadd.f32 %v759_v20, %v642_v37  ;;  %v393_v22 = vpop.f32.mrb[15].mxu1  ;;  %785 = vmatmul.mubr.bf16.gmra.mrb[24].mxu0 %v426_v14  ;;  %v419_v24 = vmax.f32 %v399_v17, 0.0 }
 0x1df   :  { %v394_v23 = vadd.f32 %v642_v37, %v393_v22  ;;  %v417_v26 = vmax.f32 %v391_v19, 0.0 }
 0x1e0   :  { %v420_v25 = vmax.f32 %v402_v21, 0.0 }
 0x1e1   :  { %v418_v27 = vmax.f32 %v394_v23, 0.0 }
 0x1e2   :  { %v428_v28 = vpack.c.bf16 %v420_v25, %v419_v24 }
 0x1e3   :  { %v427_v29 = vpack.c.bf16 %v418_v27, %v417_v26 }
 0x1e5   :  { %788 = vmatprep.mubr.bf16.mxu1 %v427_v29 }
 0x1e6   :  { %789 = vmatmul.mubr.bf16.vlgmr.msra.gmra.mrb[16].mxu1 %v428_v28 }
 0x2a1   :  { %v778_v31 = vpop.f32.mrb[16].mxu0 }
 0x2a2   :  { %v543_v32 = vadd.f32 %v778_v31, %v651_v30  ;;  %v534_v33 = vpop.f32.mrb[17].mxu0 }
 0x2a3   :  { %v535_v34 = vadd.f32 %v651_v30, %v534_v33  ;;  %v779_v35 = vpop.f32.mrb[18].mxu0 }
 0x2a4   :  { %599 = vst [vmem:[#allocation2 + $0x10] sm:$0xff] %v543_v32  ;;  %v546_v36 = vadd.f32 %v779_v35, %v651_v30  ;;  %v537_v37 = vpop.f32.mrb[19].mxu0 }
 0x2a5   :  { %597 = vst [vmem:[#allocation2] sm:$0xff] %v535_v34  ;;  %v538_v38 = vadd.f32 %v651_v30, %v537_v37 }
 0x2a6   :  { %600 = vst [vmem:[#allocation2 + $0x18] sm:$0xff] %v546_v36 }
 0x2a7   :  { %598 = vst [vmem:[#allocation2 + $0x8] sm:$0xff] %v538_v38 }
 0x2a9   :  { %v782_v39 = vpop.f32.mrb[20].mxu0 }
 0x2aa   :  { %v559_v40 = vadd.f32 %v782_v39, %v651_v30  ;;  %v550_v41 = vpop.f32.mrb[21].mxu0 }
 0x2ab   :  { %v551_v42 = vadd.f32 %v651_v30, %v550_v41  ;;  %v783_v43 = vpop.f32.mrb[22].mxu0 }
 0x2ac   :  { %603 = vst [vmem:[#allocation2 + $0x30] sm:$0xff] %v559_v40  ;;  %v562_v44 = vadd.f32 %v783_v43, %v651_v30  ;;  %v553_v45 = vpop.f32.mrb[23].mxu0 }
 0x2ad   :  { %601 = vst [vmem:[#allocation2 + $0x20] sm:$0xff] %v551_v42  ;;  %v554_v46 = vadd.f32 %v651_v30, %v553_v45 }
 0x2ae   :  { %604 = vst [vmem:[#allocation2 + $0x38] sm:$0xff] %v562_v44 }
 0x2af   :  { %602 = vst [vmem:[#allocation2 + $0x28] sm:$0xff] %v554_v46 }
 0x2b1   :  { %v786_v47 = vpop.f32.mrb[24].mxu0 }
 0x2b2   :  { %v575_v48 = vadd.f32 %v786_v47, %v651_v30  ;;  %v566_v49 = vpop.f32.mrb[25].mxu0 }
 0x2b3   :  { %v567_v50 = vadd.f32 %v651_v30, %v566_v49  ;;  %v787_v51 = vpop.f32.mrb[26].mxu0 }
 0x2b4   :  { %607 = vst [vmem:[#allocation2 + $0x50] sm:$0xff] %v575_v48  ;;  %v578_v52 = vadd.f32 %v787_v51, %v651_v30  ;;  %v569_v53 = vpop.f32.mrb[27].mxu0 }
 0x2b5   :  { %605 = vst [vmem:[#allocation2 + $0x40] sm:$0xff] %v567_v50  ;;  %v570_v54 = vadd.f32 %v651_v30, %v569_v53 }
 0x2b6   :  { %608 = vst [vmem:[#allocation2 + $0x58] sm:$0xff] %v578_v52 }
 0x2b7   :  { %606 = vst [vmem:[#allocation2 + $0x48] sm:$0xff] %v570_v54 }
 0x2b9   :  { %v790_v55 = vpop.f32.mrb[16].mxu1 }
 0x2ba   :  { %v591_v56 = vadd.f32 %v790_v55, %v651_v30  ;;  %v582_v57 = vpop.f32.mrb[17].mxu1 }
 0x2bb   :  { %v583_v58 = vadd.f32 %v651_v30, %v582_v57  ;;  %v791_v59 = vpop.f32.mrb[18].mxu1 }
 0x2bc   :  { %611 = vst [vmem:[#allocation2 + $0x70] sm:$0xff] %v591_v56  ;;  %v594_v60 = vadd.f32 %v791_v59, %v651_v30  ;;  %v585_v61 = vpop.f32.mrb[19].mxu1 }
 0x2bd   :  { %609 = vst [vmem:[#allocation2 + $0x60] sm:$0xff] %v583_v58  ;;  %v586_v62 = vadd.f32 %v651_v30, %v585_v61 }
 0x2be   :  { %612 = vst [vmem:[#allocation2 + $0x78] sm:$0xff] %v594_v60 }
 0x2bf   :  { %610 = vst [vmem:[#allocation2 + $0x68] sm:$0xff] %v586_v62 }
 0x2c0   :  { %842 = shalt.err (!%p839_p4)
}
 0x2c1   :  { %s843_s29 = scalar_lea.hbm %s1078_s7, 2048 }
 0x2c2   :  { %p844_p5 = scmp.ne.s32.totalorder %s1078_s7, %s843_s29  ;;  %p847_p6 = scmp.lt.u32.totalorder %s843_s29, %s1078_s7 }
 0x2c4   :  { %p849_p7 = pnand %p847_p6, %p844_p5 }
 0x2c6   :  { %852 = shalt.err (!%p849_p7)
}
 0x2c7   :  { %s856_s0 = smov 128   ;;  %s857_s11 = smov 8  }
 0x2c8   :  { %624 = dma.vmem_to_hbm [thread:$0]  %s619_s25, 2048, %s1078_s7, [#allocation3], %s856_s0, %s856_s0, %s857_s11  }
 0x2c9   :  { %853 = dma.done.wait [#allocation3], 2048  }
 0x2ca   :  { %854 = vsyncadd [#allocation3], 4294965248 }
 0x2cb   :  { %628 = vsyncpa [#allocation3], 1 }

</bundles_post_ra>
